<compile_context>
chip_gen: v6e
topology: v6e:2x2x1
jax: 0.10.0
libtpu: 0.0.40
codegen_flags: <defaults>
</compile_context>

<pallas_src>
import functools

import jax
import jax.numpy as jnp
from jax.experimental import pallas as pl
from jax.experimental.pallas import tpu as pltpu

LANE = 512        # lane-dense last dim (multiple of 128)
ROW_BLOCK = 512   # sublane rows per tile -> (512, 512) f32 = 1 MiB per input


def _sse_kernel(p_ref, t_ref, o_ref, acc_ref, *, row_block):
    """Accumulate sum((p - t)^2) of the current (row_block, LANE) tile."""
    # Reset the vector accumulator at the start of each chunk's inner loop.
    @pl.when(pl.program_id(1) == 0)
    def _():
        acc_ref[...] = jnp.zeros_like(acc_ref)

    # Pure-VPU accumulation: walk the tile in (8, LANE) sublane groups so the
    # per-step work is elementwise sub/mul/add only (no per-step cross-lane or
    # cross-sublane reduce, no scalar SMEM read-modify-write).
    part = acc_ref[...]
    for k in range(row_block // 8):
        p = p_ref[k * 8:(k + 1) * 8, :].astype(jnp.float32)
        t = t_ref[k * 8:(k + 1) * 8, :].astype(jnp.float32)
        d = p - t
        part = part + d * d
    acc_ref[...] = part

    # One small cross-sublane reduce per chunk; output row stays lane-dense.
    @pl.when(pl.program_id(1) == pl.num_programs(1) - 1)
    def _():
        o_ref[...] = jnp.sum(acc_ref[...], axis=0, keepdims=True)


def topo_loss_mse_3d(pred, target, weight_mask=None):
    """JAX/Pallas equivalent of TopoLossMSE3D.forward (see TODO above).

    pred, target: (B, C, D, H, W) arrays. Returns a float32 scalar.
    `weight_mask` is accepted for API parity but unused (as in the reference
    module's forward).
    """
    assert pred.shape == target.shape and pred.ndim == 5
    del weight_mask

    total = 1
    for s in pred.shape:
        total *= s
    p_flat = pred.reshape(total)
    t_flat = target.reshape(total)

    rows = total // LANE
    row_block = min(ROW_BLOCK, (rows // 8) * 8)

    if row_block == 0:
        # Volume smaller than one (8, LANE) tile: plain JAX reduction.
        d = p_flat.astype(jnp.float32) - t_flat.astype(jnp.float32)
        return jnp.sum(d * d)

    n_tiles = rows // row_block

    # Megacore: largest chunk count (<= 8) that divides n_tiles becomes a
    # "parallel" leading grid axis; per-chunk partials are reduced in the
    # wrapper. Falls back to 1 chunk (still correct) if n_tiles is odd/prime.
    n_chunks = 1
    for c in (8, 4, 2):
        if n_tiles % c == 0:
            n_chunks = c
            break
    tiles_per_chunk = n_tiles // n_chunks

    main_elems = n_tiles * row_block * LANE
    p_main = p_flat[:main_elems].reshape(n_tiles * row_block, LANE)
    t_main = t_flat[:main_elems].reshape(n_tiles * row_block, LANE)

    tail_loss = jnp.float32(0.0)
    if main_elems < total:
        # Tiny remainder (< one tile): cheaper to sum in plain JAX than to
        # pad (padding would copy both full inputs -> ~3x HBM traffic).
        dt = (p_flat[main_elems:].astype(jnp.float32)
              - t_flat[main_elems:].astype(jnp.float32))
        tail_loss = jnp.sum(dt * dt)

    kernel = functools.partial(_sse_kernel, row_block=row_block)
    partials = pl.pallas_call(
        kernel,
        out_shape=jax.ShapeDtypeStruct((n_chunks, LANE), jnp.float32),
        grid_spec=pltpu.PrefetchScalarGridSpec(
            num_scalar_prefetch=0,
            grid=(n_chunks, tiles_per_chunk),
            in_specs=[
                pl.BlockSpec((row_block, LANE),
                             lambda c, t: (c * tiles_per_chunk + t, 0)),
                pl.BlockSpec((row_block, LANE),
                             lambda c, t: (c * tiles_per_chunk + t, 0)),
            ],
            out_specs=pl.BlockSpec((1, LANE), lambda c, t: (c, 0)),
            scratch_shapes=[pltpu.VMEM((8, LANE), jnp.float32)],
        ),
        compiler_params=pltpu.CompilerParams(
            dimension_semantics=("parallel", "arbitrary")),
    )(p_main, t_main)

    return jnp.sum(partials) + tail_loss


if __name__ == "__main__":
    key = jax.random.PRNGKey(0)
    k1, k2 = jax.random.split(key)

    # Small shapes consistent with a 5D (B, C, D, H, W) segmentation volume.
    B, C, D, H, W = 2, 4, 8, 16, 16
    pred = jax.random.uniform(k1, (B, C, D, H, W), dtype=jnp.float32)
    target = (jax.random.uniform(k2, (B, C, D, H, W)) > 0.5).astype(jnp.float32)

    loss = topo_loss_mse_3d(pred, target)
    jax.block_until_ready(loss)

    # Pure-JAX reference of the implemented semantics (sum of squared errors
    # accumulated over every (batch, channel) slice).
    ref = jnp.sum((pred.astype(jnp.float32) - target.astype(jnp.float32)) ** 2)
    assert jnp.allclose(loss, ref, rtol=1e-5, atol=1e-4), (loss, ref)

    print("KERNEL_OK")
</pallas_src>

<mosaic_0001>
module attributes {stable_mosaic.version = 11 : i64} {
  func.func @_sse_kernel(%arg0: i32, %arg1: i32, %arg2: memref<32x512xf32, #tpu.memory_space<vmem>>, %arg3: memref<32x512xf32, #tpu.memory_space<vmem>>, %arg4: memref<1x512xf32, #tpu.memory_space<vmem>>, %arg5: memref<8x512xf32, #tpu.memory_space<vmem>>) attributes {dimension_semantics = [#tpu.dimension_semantics<parallel>, #tpu.dimension_semantics<arbitrary>], iteration_bounds = array<i64: 1, 1>, scalar_prefetch = 0 : i64, scratch_operands = 1 : i64, tpu.core_type = #tpu.core_type<tc>, window_params = [{transform_indices = @transform_0, window_bounds = array<i64: 32, 512>}, {transform_indices = @transform_1, window_bounds = array<i64: 32, 512>}, {transform_indices = @transform_2, window_bounds = array<i64: 1, 512>}]} {
    %c0_i32 = arith.constant 0 : i32
    %0 = arith.cmpi eq, %arg1, %c0_i32 : i32
    %1 = arith.extui %0 : i1 to i32
    %c0_i32_0 = arith.constant 0 : i32
    %2 = arith.cmpi ne, %1, %c0_i32_0 : i32
    scf.if %2 {
      %cst = arith.constant 0.000000e+00 : f32
      %28 = vector.broadcast %cst : f32 to vector<8x512xf32>
      %c0_19 = arith.constant 0 : index
      %c0_20 = arith.constant 0 : index
      %29 = vector.load %arg5[%c0_19, %c0_20] : memref<8x512xf32, #tpu.memory_space<vmem>>, vector<8x512xf32>
      tpu.vector_store %arg5[%c0_19, %c0_20], %28 {strides = array<i32>} : memref<8x512xf32, #tpu.memory_space<vmem>>, vector<8x512xf32>,
    } else {
    }
    %c0 = arith.constant 0 : index
    %c0_1 = arith.constant 0 : index
    %3 = vector.load %arg5[%c0, %c0_1] : memref<8x512xf32, #tpu.memory_space<vmem>>, vector<8x512xf32>
    %c0_2 = arith.constant 0 : index
    %c0_3 = arith.constant 0 : index
    %4 = vector.load %arg2[%c0_2, %c0_3] : memref<32x512xf32, #tpu.memory_space<vmem>>, vector<8x512xf32>
    %c0_4 = arith.constant 0 : index
    %c0_5 = arith.constant 0 : index
    %5 = vector.load %arg3[%c0_4, %c0_5] : memref<32x512xf32, #tpu.memory_space<vmem>>, vector<8x512xf32>
    %6 = arith.subf %4, %5 : vector<8x512xf32>
    %7 = arith.mulf %6, %6 : vector<8x512xf32>
    %8 = arith.addf %3, %7 : vector<8x512xf32>
    %c8 = arith.constant 8 : index
    %c0_6 = arith.constant 0 : index
    %9 = vector.load %arg2[%c8, %c0_6] : memref<32x512xf32, #tpu.memory_space<vmem>>, vector<8x512xf32>
    %c8_7 = arith.constant 8 : index
    %c0_8 = arith.constant 0 : index
    %10 = vector.load %arg3[%c8_7, %c0_8] : memref<32x512xf32, #tpu.memory_space<vmem>>, vector<8x512xf32>
    %11 = arith.subf %9, %10 : vector<8x512xf32>
    %12 = arith.mulf %11, %11 : vector<8x512xf32>
    %13 = arith.addf %8, %12 : vector<8x512xf32>
    %c16 = arith.constant 16 : index
    %c0_9 = arith.constant 0 : index
    %14 = vector.load %arg2[%c16, %c0_9] : memref<32x512xf32, #tpu.memory_space<vmem>>, vector<8x512xf32>
    %c16_10 = arith.constant 16 : index
    %c0_11 = arith.constant 0 : index
    %15 = vector.load %arg3[%c16_10, %c0_11] : memref<32x512xf32, #tpu.memory_space<vmem>>, vector<8x512xf32>
    %16 = arith.subf %14, %15 : vector<8x512xf32>
    %17 = arith.mulf %16, %16 : vector<8x512xf32>
    %18 = arith.addf %13, %17 : vector<8x512xf32>
    %c24 = arith.constant 24 : index
    %c0_12 = arith.constant 0 : index
    %19 = vector.load %arg2[%c24, %c0_12] : memref<32x512xf32, #tpu.memory_space<vmem>>, vector<8x512xf32>
    %c24_13 = arith.constant 24 : index
    %c0_14 = arith.constant 0 : index
    %20 = vector.load %arg3[%c24_13, %c0_14] : memref<32x512xf32, #tpu.memory_space<vmem>>, vector<8x512xf32>
    %21 = arith.subf %19, %20 : vector<8x512xf32>
    %22 = arith.mulf %21, %21 : vector<8x512xf32>
    %23 = arith.addf %18, %22 : vector<8x512xf32>
    %c0_15 = arith.constant 0 : index
    %c0_16 = arith.constant 0 : index
    %24 = vector.load %arg5[%c0_15, %c0_16] : memref<8x512xf32, #tpu.memory_space<vmem>>, vector<8x512xf32>
    tpu.vector_store %arg5[%c0_15, %c0_16], %23 {strides = array<i32>} : memref<8x512xf32, #tpu.memory_space<vmem>>, vector<8x512xf32>,
    %c0_i32_17 = arith.constant 0 : i32
    %25 = arith.cmpi eq, %arg1, %c0_i32_17 : i32
    %26 = arith.extui %25 : i1 to i32
    %c0_i32_18 = arith.constant 0 : i32
    %27 = arith.cmpi ne, %26, %c0_i32_18 : i32
    scf.if %27 {
      %c0_19 = arith.constant 0 : index
      %c0_20 = arith.constant 0 : index
      %28 = vector.load %arg5[%c0_19, %c0_20] : memref<8x512xf32, #tpu.memory_space<vmem>>, vector<8x512xf32>
      %cst = arith.constant dense<0.000000e+00> : vector<512xf32>
      %29 = vector.multi_reduction <add>, %28, %cst [0] : vector<8x512xf32> to vector<512xf32>
      %30 = vector.shape_cast %29 : vector<512xf32> to vector<1x512xf32>
      %c0_21 = arith.constant 0 : index
      %c0_22 = arith.constant 0 : index
      %31 = vector.load %arg4[%c0_21, %c0_22] : memref<1x512xf32, #tpu.memory_space<vmem>>, vector<1x512xf32>
      tpu.vector_store %arg4[%c0_21, %c0_22], %30 {strides = array<i32>} : memref<1x512xf32, #tpu.memory_space<vmem>>, vector<1x512xf32>,
    } else {
    }
    return
  }
  func.func @transform_0(%arg0: i32, %arg1: i32) -> (i32, i32) {
    %c1_i32 = arith.constant 1 : i32
    %0 = arith.muli %arg0, %c1_i32 : i32
    %1 = arith.addi %0, %arg1 : i32
    %c0_i32 = arith.constant 0 : i32
    %c0_i32_0 = arith.constant 0 : i32
    return %1, %c0_i32 : i32, i32
  }
  func.func @transform_1(%arg0: i32, %arg1: i32) -> (i32, i32) {
    %c1_i32 = arith.constant 1 : i32
    %0 = arith.muli %arg0, %c1_i32 : i32
    %1 = arith.addi %0, %arg1 : i32
    %c0_i32 = arith.constant 0 : i32
    %c0_i32_0 = arith.constant 0 : i32
    return %1, %c0_i32 : i32, i32
  }
  func.func @transform_2(%arg0: i32, %arg1: i32) -> (i32, i32) {
    %c0_i32 = arith.constant 0 : i32
    %c0_i32_0 = arith.constant 0 : i32
    return %arg0, %c0_i32 : i32, i32
  }
}

</mosaic_0001>

<bundles_post_ra>
// kernel: tpu_custom_call.1
= control target key start
LH: loop header
LB: loop body
LE: loop exit
PB: predicated region body
PF: predicated region fallthrough
CT: control target
= control target key end

     0   :  { %7 = vsyncpa [#allocation4], 0  ;;  %s333_s0 = inlined_call_operand.hbm [shape: f32[32,512], index: 0, kind: input, shape index: {}]   ;;  %s334_s1 = inlined_call_operand.hbm [shape: f32[32,512], index: 1, kind: input, shape index: {}]   ;;  %s335_s2 = inlined_call_operand.hbm [shape: f32[1,512], index: 2, kind: output, shape index: {}]  }
   0x1   :  { %8 = vsyncpa [#allocation7], 0 }
   0x2   :  { %9 = vsyncpa [#allocation5], 0  ;;  %s303_s9 = smov [#allocation3]  }
   0x3   :  { %s20_s10 = sshll.u32 %s303_s9, 4  ;;  %s21_s10 = int_to_ptr.vmem [resolvable:$true] %s20_s10 }
   0x4   :  { %s245_s11 = scalar_lea.vmem %s21_s10, 2048  ;;  %p250_p1 = scmp.lt.s32.totalorder %s21_s10, %s21_s10 }
   0x5   :  { %p246_p0 = scmp.ne.s32.totalorder %s21_s10, %s245_s11  ;;  %p251_p2 = scmp.lt.s32.totalorder %s245_s11, %s245_s11 }
   0x7   :  { %p252_p3 = por %p251_p2, %p250_p1 }
   0x9   :  { %p253_p4 = pnand %p252_p3, %p246_p0 }
   0xb   :  { %256 = shalt.err (!%p253_p4)
}
   0xc   :  { %s304_s12 = smov 512   ;;  %s305_s13 = smov 32  }
   0xd   :  { %26 = dma.hbm_to_vmem [thread:$0]  %s333_s0, 2048, %s21_s10, [#allocation4], %s304_s12, %s304_s12, %s305_s13  }
   0xe   :  { %s306_s16 = smov [#allocation6]  }
   0xf   :  { %s37_s17 = sshll.u32 %s306_s16, 4  ;;  %s38_s17 = int_to_ptr.vmem [resolvable:$true] %s37_s17 }
  0x10   :  { %s265_s18 = scalar_lea.vmem %s38_s17, 2048  ;;  %p270_p6 = scmp.lt.s32.totalorder %s38_s17, %s38_s17 }
  0x11   :  { %p266_p5 = scmp.ne.s32.totalorder %s38_s17, %s265_s18  ;;  %p271_p7 = scmp.lt.s32.totalorder %s265_s18, %s265_s18 }
  0x13   :  { %p272_p8 = por %p271_p7, %p270_p6 }
  0x15   :  { %p273_p9 = pnand %p272_p8, %p266_p5 }
  0x17   :  { %276 = shalt.err (!%p273_p9)
}
  0x18   :  { %43 = dma.hbm_to_vmem [thread:$0]  %s334_s1, 2048, %s38_s17, [#allocation7], %s304_s12, %s304_s12, %s305_s13  }
  0x19   :  { %297 = dma.done.wait [#allocation4], 2048  }
  0x1a   :  { %298 = vsyncadd [#allocation4], 4294965248 }
  0x1b   :  { %299 = dma.done.wait [#allocation7], 2048  }
  0x1c   :  { %300 = vsyncadd [#allocation7], 4294965248  ;;  %v66_v0 = vld [vmem:[#allocation3] sm:$0xff]  ;;  %v67_v1 = vld [vmem:[#allocation3 + $0x8] sm:$0xff]  ;;  %s308_s0 = smov [#allocation8]  }
  0x1d   :  { %v68_v2 = vld [vmem:[#allocation3 + $0x10] sm:$0xff]  ;;  %v69_v3 = vld [vmem:[#allocation3 + $0x18] sm:$0xff]  ;;  %v70_v4 = vld [vmem:[#allocation6] sm:$0xff]  ;;  %s221_s1 = sshll.u32 %s308_s0, 4  ;;  %s222_s1 = int_to_ptr.vmem [resolvable:$true] %s221_s1 }
  0x1e   :  { %v71_v5 = vld [vmem:[#allocation6 + $0x8] sm:$0xff]  ;;  %v72_v6 = vld [vmem:[#allocation6 + $0x10] sm:$0xff]  ;;  %v73_v7 = vld [vmem:[#allocation6 + $0x18] sm:$0xff]  ;;  %v74_v8 = vsub.f32 %v66_v0, %v70_v4  ;;  %s277_s21 = scalar_lea.vmem %s222_s1, 64  ;;  %p282_p11 = scmp.lt.s32.totalorder %s222_s1, %s222_s1 }
  0x1f   :  { %v75_v9 = vsub.f32 %v67_v1, %v71_v5  ;;  %v86_v10 = vld [vmem:[#allocation3 + $0x20] sm:$0xff]  ;;  %v76_v11 = vsub.f32 %v68_v2, %v72_v6  ;;  %v77_v12 = vsub.f32 %v69_v3, %v73_v7  ;;  %v87_v13 = vld [vmem:[#allocation3 + $0x28] sm:$0xff]  ;;  %v88_v14 = vld [vmem:[#allocation3 + $0x30] sm:$0xff]  ;;  %p278_p10 = scmp.ne.s32.totalorder %s222_s1, %s277_s21  ;;  %p283_p12 = scmp.lt.s32.totalorder %s277_s21, %s277_s21 }
  0x20   :  { %v89_v15 = vld [vmem:[#allocation3 + $0x38] sm:$0xff]  ;;  %v90_v16 = vld [vmem:[#allocation6 + $0x20] sm:$0xff]  ;;  %v91_v17 = vld [vmem:[#allocation6 + $0x28] sm:$0xff]  ;;  %v78_v19 = vmul.f32 %v74_v8, %v74_v8 }
  0x21   :  { %v92_v18 = vld [vmem:[#allocation6 + $0x30] sm:$0xff]  ;;  %v79_v20 = vmul.f32 %v75_v9, %v75_v9  ;;  %v93_v21 = vld [vmem:[#allocation6 + $0x38] sm:$0xff]  ;;  %v94_v22 = vsub.f32 %v86_v10, %v90_v16  ;;  %v95_v23 = vsub.f32 %v87_v13, %v91_v17  ;;  %v106_v24 = vld [vmem:[#allocation3 + $0x40] sm:$0xff]  ;;  %v80_v26 = vmul.f32 %v76_v11, %v76_v11  ;;  %p284_p13 = por %p283_p12, %p282_p11 }
  0x22   :  { %v107_v25 = vld [vmem:[#allocation3 + $0x48] sm:$0xff]  ;;  %v81_v27 = vmul.f32 %v77_v12, %v77_v12  ;;  %v96_v28 = vsub.f32 %v88_v14, %v92_v18  ;;  %v97_v29 = vsub.f32 %v89_v15, %v93_v21  ;;  %v108_v30 = vld [vmem:[#allocation3 + $0x50] sm:$0xff]  ;;  %v109_v31 = vld [vmem:[#allocation3 + $0x58] sm:$0xff]  ;;  %v307_v18 = vmov 1966171168  }
  0x23   :  { %v110_v32 = vld [vmem:[#allocation6 + $0x40] sm:$0xff]  ;;  %v98_v33 = vmul.f32 %v94_v22, %v94_v22  ;;  %v99_v34 = vmul.f32 %v95_v23, %v95_v23  ;;  %v111_v35 = vld [vmem:[#allocation6 + $0x48] sm:$0xff]  ;;  %v112_v36 = vld [vmem:[#allocation6 + $0x50] sm:$0xff]  ;;  %p285_p0 = pnand %p284_p13, %p278_p10 }
  0x24   :  { %v113_v37 = vld [vmem:[#allocation6 + $0x58] sm:$0xff]  ;;  %v114_v38 = vsub.f32 %v106_v24, %v110_v32  ;;  %v100_v39 = vmul.f32 %v96_v28, %v96_v28  ;;  %v101_v40 = vmul.f32 %v97_v29, %v97_v29  ;;  %v115_v41 = vsub.f32 %v107_v25, %v111_v35  ;;  %v126_v43 = vld [vmem:[#allocation3 + $0x60] sm:$0xff]  ;;  %v127_v44 = vld [vmem:[#allocation3 + $0x68] sm:$0xff] }
  0x25   :  { %v116_v42 = vsub.f32 %v108_v30, %v112_v36  ;;  %v128_v45 = vld [vmem:[#allocation3 + $0x70] sm:$0xff]  ;;  %v102_v46 = vadd.f32 %v98_v33, %v78_v19  ;;  %v103_v47 = vadd.f32 %v99_v34, %v79_v20  ;;  %v117_v48 = vsub.f32 %v109_v31, %v113_v37  ;;  %v129_v50 = vld [vmem:[#allocation3 + $0x78] sm:$0xff]  ;;  %v130_v51 = vld [vmem:[#allocation6 + $0x60] sm:$0xff] }
  0x26   :  { %v118_v49 = vmul.f32 %v114_v38, %v114_v38  ;;  %v131_v52 = vld [vmem:[#allocation6 + $0x68] sm:$0xff]  ;;  %v104_v53 = vadd.f32 %v100_v39, %v80_v26  ;;  %v105_v54 = vadd.f32 %v101_v40, %v81_v27  ;;  %v119_v55 = vmul.f32 %v115_v41, %v115_v41  ;;  %v132_v57 = vld [vmem:[#allocation6 + $0x70] sm:$0xff]  ;;  %v133_v58 = vld [vmem:[#allocation6 + $0x78] sm:$0xff] }
  0x27   :  { %v120_v56 = vmul.f32 %v116_v42, %v116_v42  ;;  %v121_v59 = vmul.f32 %v117_v48, %v117_v48  ;;  %v134_v61 = vsub.f32 %v126_v43, %v130_v51  ;;  %v135_v62 = vsub.f32 %v127_v44, %v131_v52 }
  0x28   :  { %v122_v60 = vadd.f32 %v118_v49, %v102_v46  ;;  %v123_v63 = vadd.f32 %v119_v55, %v103_v47  ;;  %v136_v1 = vsub.f32 %v128_v45, %v132_v57  ;;  %v137_v2 = vsub.f32 %v129_v50, %v133_v58 }
  0x29   :  { %v124_v0 = vadd.f32 %v120_v56, %v104_v53  ;;  %v125_v3 = vadd.f32 %v121_v59, %v105_v54  ;;  %v138_v4 = vmul.f32 %v134_v61, %v134_v61  ;;  %v139_v5 = vmul.f32 %v135_v62, %v135_v62 }
  0x2a   :  { %v140_v6 = vmul.f32 %v136_v1, %v136_v1  ;;  %v141_v7 = vmul.f32 %v137_v2, %v137_v2  ;;  %v188_v19 = vunpack.c.l.s4 %v307_v18  ;;  %v190_v20 = vlaneseq }
  0x2b   :  { %v142_v8 = vadd.f32 %v138_v4, %v122_v60  ;;  %v143_v9 = vadd.f32 %v139_v5, %v123_v63 }
  0x2c   :  { %v144_v10 = vadd.f32 %v140_v6, %v124_v0  ;;  %v145_v11 = vadd.f32 %v141_v7, %v125_v3  ;;  %v189_v29 = vunpack.c.0.s8 %v188_v19  ;;  %v191_v30 = vshrl.u32 %v190_v20, 7 }
  0x2d   :  { %v157_v12 = vrot.slane %v142_v8, 4  ;;  %v163_v13 = vrot.slane %v143_v9, 4  ;;  %vm212_vm0 = vcmp.lt.s32.totalorder %v190_v20, 512 }
  0x2e   :  { %v169_v14 = vrot.slane %v144_v10, 4  ;;  %v175_v15 = vrot.slane %v145_v11, 4  ;;  %v192_v39 = vsub.s32 %v189_v29, %v191_v30 }
  0x2f   :  { %v158_v16 = vadd.f32 %v157_v12, %v142_v8  ;;  %v164_v17 = vadd.f32 %v163_v13, %v143_v9 }
  0x30   :  { %v170_v21 = vadd.f32 %v169_v14, %v144_v10  ;;  %v176_v22 = vadd.f32 %v175_v15, %v145_v11 }
  0x31   :  { %v159_v23 = vrot.slane %v158_v16, 2  ;;  %v165_v24 = vrot.slane %v164_v17, 2 }
  0x32   :  { %v171_v25 = vrot.slane %v170_v21, 2  ;;  %v177_v26 = vrot.slane %v176_v22, 2 }
  0x33   :  { %v160_v27 = vadd.f32 %v159_v23, %v158_v16  ;;  %v166_v28 = vadd.f32 %v165_v24, %v164_v17 }
  0x34   :  { %v172_v31 = vadd.f32 %v171_v25, %v170_v21  ;;  %v178_v32 = vadd.f32 %v177_v26, %v176_v22 }
  0x35   :  { %v161_v33 = vrot.slane %v160_v27, 1  ;;  %v167_v34 = vrot.slane %v166_v28, 1 }
  0x36   :  { %v173_v35 = vrot.slane %v172_v31, 1  ;;  %v179_v36 = vrot.slane %v178_v32, 1 }
  0x37   :  { %v162_v37 = vadd.f32 %v161_v33, %v160_v27  ;;  %v168_v38 = vadd.f32 %v167_v34, %v166_v28 }
  0x38   :  { %v174_v40 = vadd.f32 %v173_v35, %v172_v31  ;;  %v180_v41 = vadd.f32 %v179_v36, %v178_v32 }
  0x39   :  { %v185_v42 = vcombine.low %v162_v37, %v168_v38 }
  0x3a   :  { %v186_v43 = vcombine.low %v174_v40, %v180_v41 }
  0x3b   :  { %v193_v44 = vrot.slane %v185_v42, %v192_v39 }
  0x3c   :  { %v200_v45 = vrot.slane %v186_v43, %v192_v39 }
  0x3e   :  { %v201_v46 = vcombine.low %v193_v44, %v200_v45 }
  0x40   :  { %v208_v47 = vrot.slane %v201_v46, %v192_v39 }
  0x42   :  { %214 = vst.msk [vmem:[#allocation8] sm:$0xf] %vm212_vm0, %v208_v47 }
  0x43   :  { %288 = shalt.err (!%p285_p0)
}
  0x44   :  { %224 = dma.vmem_to_hbm [thread:$0]  %s222_s1, 64, %s335_s2, [#allocation5]  }
  0x45   :  { %301 = dma.done.wait [#allocation5], 64  }
  0x46   :  { %302 = vsyncadd [#allocation5], 4294967232 }
  0x47   :  { %228 = vsyncpa [#allocation4], 1 }
  0x48   :  { %229 = vsyncpa [#allocation7], 1 }
  0x49   :  { %230 = vsyncpa [#allocation5], 1 }

</bundles_post_ra>
